<compile_context>
chip_gen: v7x
topology: tpu7x:2x2x1
jax: 0.10.0
libtpu: 0.0.40
codegen_flags: <defaults>
</compile_context>

<pallas_src>
import jax
import jax.numpy as jnp
from jax.experimental import pallas as pl
from jax.experimental.pallas import tpu as pltpu


# ---------------------------------------------------------------------------
# Pass 1: per-sample channel sums (sum over HW), tiled along HW.
#   x block   : [1, C, T]  (C on sublanes, HW tile on lanes)
#   sum block : [1, C, 1]  accumulator, resident across the HW-tile grid axis
# ---------------------------------------------------------------------------
def _channel_sum_kernel(x_ref, sum_ref):
    @pl.when(pl.program_id(1) == 0)
    def _():
        sum_ref[...] = jnp.zeros_like(sum_ref)

    partial = jnp.sum(x_ref[0].astype(jnp.float32), axis=1, keepdims=True)  # [C, 1]
    sum_ref[0] = sum_ref[0] + partial


# ---------------------------------------------------------------------------
# Pass 2: gate application.
#   out = x * (c_gate + sigmoid(ws . x + bs))
# c_gate is per-(n, c), precomputed in the wrapper; the spatial gate is a
# VPU multiply + sublane (channel) reduce done per HW tile.
# ---------------------------------------------------------------------------
def _apply_kernel(x_ref, cgate_ref, ws_ref, bs_ref, o_ref):
    x = x_ref[0]                                            # [C, T] native dtype
    xf = x.astype(jnp.float32)
    # spatial squeeze: s[hw] = sum_c ws[c] * x[c, hw] + bs   -> [1, T]
    s = jnp.sum(xf * ws_ref[...], axis=0, keepdims=True) + bs_ref[0, 0]
    gate = cgate_ref[0] + jax.nn.sigmoid(s)                 # [C,1] + [1,T] -> [C,T]
    o_ref[0] = x * gate.astype(x.dtype)                     # single fused multiply


def _hw_tile(C, HW, itemsize, max_block_bytes=2 * 1024 * 1024):
    """Largest multiple-of-128 HW tile keeping one [C, tile] block <= ~2 MiB."""
    max_lanes = max(128, (max_block_bytes // (C * itemsize)) // 128 * 128)
    hw_pad = pl.cdiv(HW, 128) * 128
    return min(max_lanes, hw_pad)


def scse_forward(x_nchw, params):
    """x_nchw: [N, C, H, W]. Returns [N, C, H, W]."""
    w1, b1, w2, b2, ws, bs = params
    N, C, H, W = x_nchw.shape
    HW = H * W

    itemsize = jnp.dtype(x_nchw.dtype).itemsize
    tile = _hw_tile(C, HW, itemsize)
    n_t = pl.cdiv(HW, tile)
    HW_pad = n_t * tile

    # NCHW is already [N, C, HW] in memory: this reshape is free (no transpose).
    x_flat = x_nchw.reshape(N, C, HW)
    if HW_pad != HW:
        # zero-pad the lane axis; zeros do not perturb the channel sums and the
        # padded columns are sliced off after the apply pass.
        x_flat = jnp.pad(x_flat, ((0, 0), (0, 0), (0, HW_pad - HW)))

    # ---- pass 1: per-sample channel sums (Pallas reduction over HW tiles) ----
    sums = pl.pallas_call(
        _channel_sum_kernel,
        out_shape=jax.ShapeDtypeStruct((N, C, 1), jnp.float32),
        grid_spec=pltpu.PrefetchScalarGridSpec(
            num_scalar_prefetch=0,
            grid=(N, n_t),
            in_specs=[pl.BlockSpec((1, C, tile), lambda n, t: (n, 0, t))],
            out_specs=pl.BlockSpec((1, C, 1), lambda n, t: (n, 0, 0)),
        ),
        compiler_params=pltpu.CompilerParams(
            dimension_semantics=("parallel", "arbitrary")),
    )(x_flat)

    # ---- cSE excite: tiny batched matmuls, hoisted out of the per-tile path ----
    mean = sums[:, :, 0] / jnp.float32(HW)                   # [N, C]
    z1 = jnp.maximum(mean @ w1 + b1, 0.0)                    # [N, Cmid]
    c_gate = jax.nn.sigmoid(z1 @ w2 + b2)                    # [N, C]
    c_gate = c_gate.astype(jnp.float32)[:, :, None]          # [N, C, 1]

    # ---- pass 2: apply gates, tiled over HW, lane-dense loads/stores ----
    out_flat = pl.pallas_call(
        _apply_kernel,
        out_shape=jax.ShapeDtypeStruct((N, C, HW_pad), x_nchw.dtype),
        grid_spec=pltpu.PrefetchScalarGridSpec(
            num_scalar_prefetch=0,
            grid=(N, n_t),
            in_specs=[
                pl.BlockSpec((1, C, tile), lambda n, t: (n, 0, t)),     # x
                pl.BlockSpec((1, C, 1), lambda n, t: (n, 0, 0)),        # c_gate
                pl.BlockSpec((C, 1), lambda n, t: (0, 0)),              # ws
                pl.BlockSpec(memory_space=pltpu.MemorySpace.SMEM),      # bs scalar
            ],
            out_specs=pl.BlockSpec((1, C, tile), lambda n, t: (n, 0, t)),
        ),
        compiler_params=pltpu.CompilerParams(
            dimension_semantics=("parallel", "parallel")),
    )(x_flat, c_gate, ws, bs)

    if HW_pad != HW:
        out_flat = out_flat[:, :, :HW]
    return out_flat.reshape(N, C, H, W)


def scse_reference(x_nchw, params):
    """Pure-JAX reference mirroring the PyTorch module."""
    w1, b1, w2, b2, ws, bs = params
    mean = jnp.mean(x_nchw, axis=(2, 3))                           # [N, C]
    z1 = jnp.maximum(mean @ w1 + b1, 0.0)                          # [N, Cmid]
    c_gate = jax.nn.sigmoid(z1 @ w2 + b2)                          # [N, C]
    s = jnp.einsum("nchw,c->nhw", x_nchw, ws[:, 0]) + bs[0, 0]     # [N, H, W]
    s_gate = jax.nn.sigmoid(s)                                     # [N, H, W]
    return (x_nchw * c_gate[:, :, None, None]
            + x_nchw * s_gate[:, None, :, :])


def init_params(key, in_channels, reduction=16):
    """Deterministic synthetic parameters matching nn.Conv2d(.,.,1) shapes.

    PyTorch conv1x1 weight [out, in, 1, 1] is stored transposed as [in, out]
    so the excite path can use row-vector @ weight directly.
    """
    c_mid = in_channels // reduction
    k1, k2, k3, k4, k5, k6 = jax.random.split(key, 6)
    w1 = jax.random.normal(k1, (in_channels, c_mid), jnp.float32) * 0.1
    b1 = jax.random.normal(k2, (1, c_mid), jnp.float32) * 0.1
    w2 = jax.random.normal(k3, (c_mid, in_channels), jnp.float32) * 0.1
    b2 = jax.random.normal(k4, (1, in_channels), jnp.float32) * 0.1
    ws = jax.random.normal(k5, (in_channels, 1), jnp.float32) * 0.1
    bs = jax.random.normal(k6, (1, 1), jnp.float32) * 0.1
    return w1, b1, w2, b2, ws, bs


if __name__ == "__main__":
    # in_channels must be >= reduction (16) so the bottleneck has >= 1 channel,
    # matching the PyTorch module's in_channels // reduction.
    N, C, H, W = 2, 32, 16, 16
    key = jax.random.PRNGKey(0)
    kx, kp = jax.random.split(key)
    x = jax.random.normal(kx, (N, C, H, W), jnp.float32)
    params = init_params(kp, C, reduction=16)

    out = scse_forward(x, params)
    out = jax.block_until_ready(out)

    ref = scse_reference(x, params)
    assert out.shape == (N, C, H, W)
    assert jnp.allclose(out, ref, atol=1e-5, rtol=1e-5), "mismatch vs reference"

    print("KERNEL_OK")
</pallas_src>

<mosaic_0001>
module attributes {stable_mosaic.version = 11 : i64} {
  func.func @_channel_sum_kernel(%arg0: i32, %arg1: i32, %arg2: memref<1x32x256xf32, #tpu.memory_space<vmem>>, %arg3: memref<1x32x1xf32, #tpu.memory_space<vmem>>) attributes {dimension_semantics = [#tpu.dimension_semantics<parallel>, #tpu.dimension_semantics<arbitrary>], iteration_bounds = array<i64: 2, 1>, scalar_prefetch = 0 : i64, scratch_operands = 0 : i64, tpu.core_type = #tpu.core_type<tc>, window_params = [{transform_indices = @transform_0, window_bounds = array<i64: 1, 32, 256>}, {transform_indices = @transform_1, window_bounds = array<i64: 1, 32, 1>}]} {
    %c0_i32 = arith.constant 0 : i32
    %0 = arith.cmpi eq, %arg1, %c0_i32 : i32
    %1 = arith.extui %0 : i1 to i32
    %c0_i32_0 = arith.constant 0 : i32
    %2 = arith.cmpi ne, %1, %c0_i32_0 : i32
    scf.if %2 {
      %cst_9 = arith.constant 0.000000e+00 : f32
      %13 = vector.broadcast %cst_9 : f32 to vector<1x32x1xf32>
      %c0_10 = arith.constant 0 : index
      %c0_11 = arith.constant 0 : index
      %c0_12 = arith.constant 0 : index
      %14 = vector.load %arg3[%c0_10, %c0_11, %c0_12] : memref<1x32x1xf32, #tpu.memory_space<vmem>>, vector<1x32x1xf32>
      tpu.vector_store %arg3[%c0_10, %c0_11, %c0_12], %13 {strides = array<i32>} : memref<1x32x1xf32, #tpu.memory_space<vmem>>, vector<1x32x1xf32>,
    } else {
    }
    %c0 = arith.constant 0 : index
    %c0_1 = arith.constant 0 : index
    %c0_2 = arith.constant 0 : index
    %3 = vector.load %arg2[%c0, %c0_1, %c0_2] : memref<1x32x256xf32, #tpu.memory_space<vmem>>, vector<1x32x256xf32>
    %4 = vector.shape_cast %3 : vector<1x32x256xf32> to vector<32x256xf32>
    %cst = arith.constant dense<0.000000e+00> : vector<32xf32>
    %5 = vector.multi_reduction <add>, %4, %cst [1] : vector<32x256xf32> to vector<32xf32>
    %6 = vector.shape_cast %5 : vector<32xf32> to vector<32x1xf32>
    %c0_3 = arith.constant 0 : index
    %c0_4 = arith.constant 0 : index
    %c0_5 = arith.constant 0 : index
    %7 = vector.load %arg3[%c0_3, %c0_4, %c0_5] : memref<1x32x1xf32, #tpu.memory_space<vmem>>, vector<1x32x1xf32>
    %8 = vector.shape_cast %7 : vector<1x32x1xf32> to vector<32x1xf32>
    %9 = arith.addf %8, %6 : vector<32x1xf32>
    %c0_6 = arith.constant 0 : index
    %c0_7 = arith.constant 0 : index
    %c0_8 = arith.constant 0 : index
    %10 = vector.load %arg3[%c0_6, %c0_7, %c0_8] : memref<1x32x1xf32, #tpu.memory_space<vmem>>, vector<1x32x1xf32>
    %11 = vector.shape_cast %10 : vector<1x32x1xf32> to vector<32x1xf32>
    %12 = vector.shape_cast %9 : vector<32x1xf32> to vector<1x32x1xf32>
    tpu.vector_store %arg3[%c0_6, %c0_7, %c0_8], %12 {strides = array<i32>} : memref<1x32x1xf32, #tpu.memory_space<vmem>>, vector<1x32x1xf32>,
    return
  }
  func.func @transform_0(%arg0: i32, %arg1: i32) -> (i32, i32, i32) {
    %c0_i32 = arith.constant 0 : i32
    %c0_i32_0 = arith.constant 0 : i32
    return %arg0, %c0_i32, %arg1 : i32, i32, i32
  }
  func.func @transform_1(%arg0: i32, %arg1: i32) -> (i32, i32, i32) {
    %c0_i32 = arith.constant 0 : i32
    %c0_i32_0 = arith.constant 0 : i32
    %c0_i32_1 = arith.constant 0 : i32
    return %arg0, %c0_i32, %c0_i32_0 : i32, i32, i32
  }
}

</mosaic_0001>

<bundles_post_ra>
// kernel: tpu_custom_call.1
= control target key start
LH: loop header
LB: loop body
LE: loop exit
PB: predicated region body
PF: predicated region fallthrough
CT: control target
= control target key end

     0   :  { %6 = vsyncpa [#allocation3], 0  ;;  %s589_s0 = inlined_call_operand.hbm [shape: f32[2,32,256], index: 0, kind: input, shape index: {}]   ;;  %s590_s1 = inlined_call_operand.vmem [shape: f32[2,32,1], index: 1, kind: output, shape index: {}]  }
   0x1   :  { %8 = vsyncpa [#allocation3 + $0x1], 0  ;;  %s443_s6 = smov 0   ;;  %s445_s7 = smov 0  }
   0x2   :  { %s447_s8 = smov 0   ;;  %s449_s9 = smov 0  }
   0x3   :  { %s451_s10 = smov 0   ;;  %s453_s11 = smov 0  }
   0x4 LB: > { %s274_s12 = sadd.s32 4294967295, %s427_s11   ;;  %s26_s13 = sadd.s32 1, %s423_s10  ;;  %s427_s11 = sphi %s453_s11, %s14_s11   ;;  %s423_s10 = sphi %s451_s10, %s598_s10   ;;  %s419_s9 = sphi %s449_s9, %s597_s9   ;;  %s415_s8 = sphi %s447_s8, %s596_s8   ;;  %s411_s7 = sphi %s445_s7, %s595_s7   ;;  %s407_s6 = sphi %s443_s6, %s594_s6  }
   0x5   : > { %p28_p0 = scmp.ge.s32.totalorder %s26_s13, 2  ;;  %s35_s14 = sadd.s32 1, %s415_s8 }
   0x6   : > { %p42_p1 = scmp.ne.s32.totalorder %s415_s8, %s411_s7  ;;  %p43_p2 = scmp.eq.s32.totalorder %s427_s11, 0 }
   0x7   : > { %s600_s13 = smov (%p28_p0, %s26_s13), 0  ;;  %p48_p4 = scmp.ne.s32.totalorder %s411_s7, %s407_s6 }
   0x8   : > { %p479_p3 = por %p43_p2, %p42_p1  ;;  %s30_s16 = ssub.s32 %s423_s10, %s600_s13 }
   0x9   : > { %p49_p5 = scmp.eq.s32.totalorder %s274_s12, 0  ;;  %p33_p6 = scmp.eq.s32.totalorder %s30_s16, 0 }
   0xa   : > { %p295_p8 = scmp.lt.s32.totalorder %s427_s11, 2  ;;  %s98_s19 = sand.u32 1, %s415_s8  }
   0xb   : > { %p486_p7 = por %p49_p5, %p48_p4  ;;  %s287_s20 = sshll.u32 %s423_s10, 10 }
   0xc   : > { %s492_s18 = scalar_select %p33_p6, %s415_s8, %s35_s14  }
   0xd   : > { %s278_s21 = sshll.u32 %s98_s19, 6  ;;  %s499_s24 = scalar_lea.hbm %s589_s0, %s287_s20 }
   0xe   : > { %s102_s25 = scalar_lea.vmem [#allocation2], %s278_s21  ;;  %p503_p9 = pnand %p295_p8, %p479_p3 }
   0xf   : > { %s111_s26 = sshll.u32 %s102_s25, 4  ;;  %s509_s28 = scalar_lea.sflag [#allocation3], %s98_s19  ;;  %s507_s26 = int_to_ptr.vmem [resolvable:$true] %s111_s26 }
  0x10   : > { %s347_s29 = scalar_lea.hbm %s499_s24, 1024  ;;  %p349_p11 = pneg %p503_p9 }
  0x11   : > { %p348_p10 = scmp.ne.s32.totalorder %s499_s24, %s347_s29  ;;  %s352_s3 = scalar_lea.hbm %s589_s0, 2048 }
  0x12   : > { %p353_p0 = scmp.lt.u32.totalorder %s499_s24, %s589_s0  ;;  %p354_p1 = scmp.lt.u32.totalorder %s352_s3, %s347_s29 }
  0x13   : > { %p350_p12 = pnand %p349_p11, %p348_p10  ;;  %p356_p3 = scmp.lt.u32.totalorder %s347_s29, %s499_s24 }
  0x14   : > { %p355_p2 = por %p354_p1, %p353_p0 }
  0x15   : > { %p351_p13 = pneg %p350_p12 }
  0x16   : > { %p357_p4 = por %p356_p3, %p355_p2 }
  0x18   : > { %p358_p5 = pnand %p357_p4, %p351_p13 }
  0x1a   : > { %361 = shalt.err (!%p358_p5)
}
  0x1b   : > { %s362_s6 = scalar_lea.vmem %s507_s26, 1024  ;;  %s429_s12 = smov [#allocation2]  }
  0x1c   : > { %p363_p6 = scmp.ne.s32.totalorder %s507_s26, %s362_s6  ;;  %s367_s14 = sshll.u32 %s429_s12, 4  ;;  %s368_s14 = int_to_ptr.vmem [resolvable:$false] %s367_s14 }
  0x1d   : > { %s369_s15 = scalar_lea.vmem %s368_s14, 2048  ;;  %p370_p12 = scmp.lt.s32.totalorder %s507_s26, %s368_s14 }
  0x1e   : > { %p365_p8 = pnand %p363_p6, %p349_p11  ;;  %p371_p0 = scmp.lt.s32.totalorder %s369_s15, %s362_s6 }
  0x20   : > { %p366_p10 = pneg %p365_p8  ;;  %p372_p1 = por %p371_p0, %p370_p12 }
  0x22   : > { %p373_p2 = pnand %p372_p1, %p366_p10 }
  0x24   : > { %376 = shalt.err (!%p373_p2)
}
  0x25   : > { %s430_s16 = smov 256   ;;  %s431_s19 = smov 16  }
  0x26   : > { %294 = dma.hbm_to_vmem [thread:$0]  (!%p503_p9), %s499_s24, 1024, %s507_s26, %s509_s28, %s430_s16, %s430_s16, %s431_s19  }
  0x27   : > { %p281_p11 = scmp.ge.s32.totalorder %s427_s11, 1  ;;  %p119_p13 = scmp.lt.s32.totalorder %s427_s11, 3 }
  0x29   : > { %p120_p3 = pnand %p281_p11, %p119_p13 }
  0x2a   : > { %s125_s20 = sand.u32 (!%p120_p3), 1, %s411_s7  }
  0x2b   : > { %123 = sbr.rel (%p120_p3) target bundleno = 204 (0xcc), region = 24  ;;  %s282_s21 = sshll.u32 (!%p120_p3), %s125_s20, 6 }
  0x2c   : > { %s126_s22 = scalar_lea.sflag (!%p120_p3), [#allocation3], %s125_s20  ;;  %s129_s23 = scalar_lea.vmem (!%p120_p3), [#allocation2], %s282_s21 }
  0x32   : > { %402 = dma.done.wait (%p486_p7), %s126_s22, 1024  }
  0x33   : > { %404 = vsyncadd (%p486_p7), %s126_s22, 4294966272  ;;  %p149_p4 = scmp.lt.s32.totalorder %s419_s9, 1  ;;  %vm158_vm0 = vcmask 7168   ;;  %v432_v0 = vmov 0.0   ;;  %v167_v1 = vld [vmem:[%s129_s23 + $0x20] sm:$0xff]  ;;  %v168_v2 = vld [vmem:[%s129_s23 + $0x28] sm:$0xff] }
  0x34   : > { %v163_v3 = vld [vmem:[%s129_s23] sm:$0xff]  ;;  %v177_v4 = vadd.f32 %v168_v2, %v167_v1  ;;  %v164_v5 = vld [vmem:[%s129_s23 + $0x8] sm:$0xff]  ;;  %v169_v6 = vld [vmem:[%s129_s23 + $0x30] sm:$0xff] }
  0x35   : > { %s602_s9 = smov (!%p149_p4, %s419_s9), 1  ;;  %v170_v7 = vld [vmem:[%s129_s23 + $0x38] sm:$0xff]  ;;  %v171_v8 = vadd.f32 %v164_v5, %v163_v3  ;;  %v165_v9 = vld [vmem:[%s129_s23 + $0x10] sm:$0xff] }
  0x36   : > { %s288_s24 = sshll.u32 %s602_s9, 5  ;;  %v166_v10 = vld [vmem:[%s129_s23 + $0x18] sm:$0xff]  ;;  %178 = vadd.xlane.f32.xlu1 %v177_v4  ;;  %v180_v11 = vadd.f32 %v170_v7, %v169_v6 }
  0x37   : > { %s549_s27 = scalar_lea.vmem %s590_s1, %s288_s24  ;;  %172 = vadd.xlane.f32.xlu0 %v171_v8  ;;  %v174_v12 = vadd.f32 %v166_v10, %v165_v9 }
  0x38   : > { %161 = vst.msk [vmem:[%s549_s27 + $0x10] sm:$0xff] %vm158_vm0, %v432_v0  ;;  %159 = vst.msk [vmem:[%s549_s27] sm:$0xff] %vm158_vm0, %v432_v0 }
  0x39   : > { %160 = vst.msk [vmem:[%s549_s27 + $0x8] sm:$0xff] %vm158_vm0, %v432_v0  ;;  %162 = vst.msk [vmem:[%s549_s27 + $0x18] sm:$0xff] %vm158_vm0, %v432_v0 }
  0x3a   : > { %181 = vadd.xlane.f32.xlu1 %v180_v11 }
  0x3b   : > { %175 = vadd.xlane.f32.xlu0 %v174_v12 }
  0x3f   : > { %v185_v13 = vld [vmem:[%s549_s27 + $0x10] sm:$0xff]  ;;  %v183_v14 = vld [vmem:[%s549_s27] sm:$0xff] }
  0x40   : > { %v186_v19 = vld [vmem:[%s549_s27 + $0x18] sm:$0xff]  ;;  %v184_v20 = vld [vmem:[%s549_s27 + $0x8] sm:$0xff] }
  0xc3   : > { %v179_v15 = vpop.xlane.xlu1 %178 }
  0xc4   : > { %v189_v16 = vadd.f32 %v185_v13, %v179_v15  ;;  %v173_v17 = vpop.xlane.xlu0 %172 }
  0xc5   : > { %v187_v18 = vadd.f32 %v183_v14, %v173_v17 }
  0xc6   : > { %194 = vst.msk [vmem:[%s549_s27 + $0x10] sm:$0xff] %vm158_vm0, %v189_v16 }
  0xc7   : > { %192 = vst.msk [vmem:[%s549_s27] sm:$0xff] %vm158_vm0, %v187_v18  ;;  %v182_v21 = vpop.xlane.xlu1 %181 }
  0xc8   : > { %v190_v22 = vadd.f32 %v186_v19, %v182_v21  ;;  %v176_v23 = vpop.xlane.xlu0 %175 }
  0xc9   : > { %v188_v24 = vadd.f32 %v184_v20, %v176_v23 }
  0xca   : > { %195 = vst.msk [vmem:[%s549_s27 + $0x18] sm:$0xff] %vm158_vm0, %v190_v22 }
  0xcb   : > { %193 = vst.msk [vmem:[%s549_s27 + $0x8] sm:$0xff] %vm158_vm0, %v188_v24 }
  0xcc PF: > { %s14_s11 = sadd.s32 1, %s427_s11   ;;  %s594_s6 = smov %s411_s7 }
  0xcd   : > { %p11_p7 = scmp.ge.s32.totalorder %s14_s11, 4   ;;  %s595_s7 = smov %s415_s8 }
  0xce   : > { %s596_s8 = smov %s492_s18  ;;  %s597_s9 = smov %s423_s10 }
  0xcf   : > { %s598_s10 = smov %s600_s13  ;;  %13 = sbr.rel (!%p11_p7) target bundleno = 4 (0x4), region = 68 }
  0xd6   :  { %217 = vsyncpa [#allocation3], 1 }
  0xd7   :  { %219 = vsyncpa [#allocation3 + $0x1], 1 }

</bundles_post_ra>
